<compile_context>
chip_gen: v7x
topology: tpu7x:2x2x1
jax: 0.10.0
libtpu: 0.0.40
codegen_flags: <defaults>
</compile_context>

<pallas_src>
import functools

import jax
import jax.numpy as jnp
import numpy as np
from jax.experimental import pallas as pl
from jax.experimental.pallas import tpu as pltpu


# ---------------------------------------------------------------------------
# Helpers
# ---------------------------------------------------------------------------
def _vmem_capacity_bytes():
    """Generation-aware VMEM capacity (falls back to 128 MiB)."""
    try:
        info = pltpu.get_tpu_info()
        cap = getattr(info, "vmem_capacity_bytes", None)
        if cap:
            return int(cap)
    except Exception:
        pass
    return 128 * 1024 * 1024


def _prep_weights(params, C):
    """Repack PyTorch-layout weights for the column-form VPU MLP.

    params: (w1 (Cr, C), b1 (Cr,), w2 (C, Cr), b2 (C,))  [nn.Linear layout]
    Returns a1 (C, Crp) = w1.T zero-padded, b1 (1, Crp), a2 (C, Crp) = w2
    zero-padded, b2 (C, 1).  Padding is exact: padded hidden units see zero
    weights and zero bias, ReLU(0) = 0, and the padded columns of a2 are zero.
    """
    w1, b1, w2, b2 = params
    Cr = w1.shape[0]
    Crp = max(128, pl.cdiv(Cr, 128) * 128)          # lane-dense hidden width
    a1 = jnp.zeros((C, Crp), jnp.float32).at[:, :Cr].set(w1.astype(jnp.float32).T)
    b1p = jnp.zeros((1, Crp), jnp.float32).at[0, :Cr].set(b1.astype(jnp.float32))
    a2 = jnp.zeros((C, Crp), jnp.float32).at[:, :Cr].set(w2.astype(jnp.float32))
    b2p = b2.reshape(C, 1).astype(jnp.float32)
    return a1, b1p, a2, b2p, Crp


def _mlp_gate(avg, mx, a1, b1, a2, b2):
    """Shared Linear-ReLU-Linear + sigmoid on per-channel column vectors.

    avg, mx : (C, 1)  pooled stats (channels on sublanes)
    a1, a2  : (C, Crp), b1 : (1, Crp), b2 : (C, 1)
    Pure VPU/XLU broadcast-mul + reduce (no MXU, no relayout of the stats).
    """
    def mlp(p):                                                   # p: (C, 1)
        h = jnp.sum(a1 * p, axis=0, keepdims=True) + b1           # (1, Crp)
        h = jnp.maximum(h, 0.0)
        return jnp.sum(a2 * h, axis=1, keepdims=True) + b2        # (C, 1)

    att = mlp(avg) + mlp(mx)                                      # (C, 1)
    return 1.0 / (1.0 + jnp.exp(-att))                            # sigmoid


# ---------------------------------------------------------------------------
# Fused path: whole (C, HW) slab resident in VMEM, grid (B,)
# ---------------------------------------------------------------------------
def _fused_kernel(x_ref, a1_ref, b1_ref, a2_ref, b2_ref, o_ref, *, inv_hw):
    # x_ref block is the full logical (C, HW) row: Mosaic masks the reductions
    # for non-128-multiple HW, so no explicit tail mask is needed here.
    x = x_ref[...].astype(jnp.float32)                            # (C, HW)
    s = jnp.sum(x, axis=-1, keepdims=True)                        # (C, 1)
    m = jnp.max(x, axis=-1, keepdims=True)                        # (C, 1)
    gate = _mlp_gate(s * inv_hw, m,
                     a1_ref[...], b1_ref[...], a2_ref[...], b2_ref[...])
    o_ref[...] = (x * gate).astype(o_ref.dtype)                   # lane bcast


# ---------------------------------------------------------------------------
# Streaming path, stage A: pooled sum/max accumulation + gate epilogue
# ---------------------------------------------------------------------------
def _pool_gate_kernel(x_ref, a1_ref, b1_ref, a2_ref, b2_ref, gate_ref,
                      sum_acc, max_acc, *, hw_valid, tile_hw, mask_tail,
                      inv_hw):
    hw_i = pl.program_id(1)
    last = pl.num_programs(1) - 1
    x = x_ref[...].astype(jnp.float32)                            # (C, tile_hw)

    @pl.when(hw_i == 0)
    def _init():
        sum_acc[...] = jnp.zeros_like(sum_acc)
        max_acc[...] = jnp.full_like(max_acc, -jnp.inf)

    if mask_tail:
        # Unmasked fast path for interior tiles; iota/selects only on the last.
        @pl.when(hw_i != last)
        def _interior():
            sum_acc[...] = sum_acc[...] + jnp.sum(x, axis=-1, keepdims=True)
            max_acc[...] = jnp.maximum(max_acc[...],
                                       jnp.max(x, axis=-1, keepdims=True))

        @pl.when(hw_i == last)
        def _tail():
            lane = jax.lax.broadcasted_iota(jnp.int32, x.shape, 1)
            valid = hw_i * tile_hw + lane < hw_valid
            xs = jnp.where(valid, x, 0.0)
            xm = jnp.where(valid, x, -jnp.inf)
            sum_acc[...] = sum_acc[...] + jnp.sum(xs, axis=-1, keepdims=True)
            max_acc[...] = jnp.maximum(max_acc[...],
                                       jnp.max(xm, axis=-1, keepdims=True))
    else:
        sum_acc[...] = sum_acc[...] + jnp.sum(x, axis=-1, keepdims=True)
        max_acc[...] = jnp.maximum(max_acc[...],
                                   jnp.max(x, axis=-1, keepdims=True))

    # MLP + sigmoid folded into the last-tile epilogue (no sum/max round-trip).
    @pl.when(hw_i == last)
    def _epilogue():
        gate_ref[...] = _mlp_gate(sum_acc[...] * inv_hw, max_acc[...],
                                  a1_ref[...], b1_ref[...],
                                  a2_ref[...], b2_ref[...])


# ---------------------------------------------------------------------------
# Streaming path, stage B: out = x * gate (broadcast fused into the consumer)
# ---------------------------------------------------------------------------
def _scale_kernel(x_ref, g_ref, o_ref):
    # x_ref: (C, tile_hw) ; g_ref: (C, 1) -> native lane broadcast on the VPU.
    o_ref[...] = (x_ref[...].astype(jnp.float32) * g_ref[...]).astype(o_ref.dtype)


# ---------------------------------------------------------------------------
# Wrapper
# ---------------------------------------------------------------------------
def channel_gate_c(x_nchw, params, *, force_streaming=False, tile_hw=None):
    """x_nchw: (B, C, H, W) float32 or bfloat16. Returns x * sigmoid(att)."""
    B, C, H, W = x_nchw.shape
    HW = H * W
    a1, b1p, a2, b2p, Crp = _prep_weights(params, C)

    x_flat = x_nchw.reshape(B, C, HW)          # contiguous collapse: no copy
    itemsize = x_flat.dtype.itemsize
    inv_hw = 1.0 / HW

    cap = _vmem_capacity_bytes()               # 64 MiB on v7x, 128 on v5e/v6e
    weight_bytes = 4 * (2 * C * Crp + Crp + C)

    w_specs = [pl.BlockSpec((C, Crp), lambda *_: (0, 0)),
               pl.BlockSpec((1, Crp), lambda *_: (0, 0)),
               pl.BlockSpec((C, Crp), lambda *_: (0, 0)),
               pl.BlockSpec((C, 1), lambda *_: (0, 0))]

    # -------------------- Fused single-pass path --------------------
    slab_f32 = 4 * C * HW
    fused_need = (4 * C * HW * itemsize       # double-buffered in + out blocks
                  + 2 * slab_f32              # headroom for f32 compiler temps
                  + 2 * weight_bytes + (1 << 20))
    if (not force_streaming) and fused_need <= int(0.45 * cap):
        vmem_limit = int(min(0.9 * cap, max(32 << 20, 2 * fused_need)))
        out = pl.pallas_call(
            functools.partial(_fused_kernel, inv_hw=inv_hw),
            out_shape=jax.ShapeDtypeStruct((B, C, HW), x_flat.dtype),
            grid_spec=pltpu.PrefetchScalarGridSpec(
                num_scalar_prefetch=0,
                grid=(B,),
                in_specs=[pl.BlockSpec((None, C, HW), lambda b: (b, 0, 0))]
                         + w_specs,
                out_specs=pl.BlockSpec((None, C, HW), lambda b: (b, 0, 0))),
            compiler_params=pltpu.CompilerParams(
                dimension_semantics=("parallel",),
                vmem_limit_bytes=vmem_limit),
            cost_estimate=pl.CostEstimate(
                flops=4 * B * C * HW,
                transcendentals=2 * B * C,
                bytes_accessed=2 * B * C * HW * itemsize + 2 * weight_bytes),
        )(x_flat, a1, b1p, a2, b2p)
        return out.reshape(B, C, H, W)

    # -------------------- Streaming fallback path --------------------
    # tile_hw decoupled from divisibility: size from the VMEM budget, clamp to
    # the (128-rounded) row length; the tail block is masked in-kernel.
    if tile_hw is None:
        budget = int(0.30 * cap)
        hw_ceil = pl.cdiv(HW, 128) * 128
        lanes_cap = max(128, (budget // max(1, 4 * C * itemsize)) // 128 * 128)
        tile_hw = int(min(hw_ceil, lanes_cap, 16384))
    else:
        tile_hw = max(128, pl.cdiv(int(tile_hw), 128) * 128)
    n_hw = pl.cdiv(HW, tile_hw)
    mask_tail = (HW % tile_hw) != 0
    vmem_limit = int(min(0.9 * cap,
                         max(32 << 20,
                             8 * C * tile_hw * itemsize
                             + 2 * weight_bytes + (4 << 20))))

    # Stage A: pooled sum/max + gate MLP epilogue -> gate (B, C, 1) f32.
    gate = pl.pallas_call(
        functools.partial(_pool_gate_kernel, hw_valid=HW, tile_hw=tile_hw,
                          mask_tail=mask_tail, inv_hw=inv_hw),
        out_shape=jax.ShapeDtypeStruct((B, C, 1), jnp.float32),
        grid_spec=pltpu.PrefetchScalarGridSpec(
            num_scalar_prefetch=0,
            grid=(B, n_hw),
            in_specs=[pl.BlockSpec((None, C, tile_hw), lambda b, hw: (b, 0, hw))]
                     + w_specs,
            out_specs=pl.BlockSpec((None, C, 1), lambda b, hw: (b, 0, 0)),
            scratch_shapes=[pltpu.VMEM((C, 1), jnp.float32),
                            pltpu.VMEM((C, 1), jnp.float32)]),
        compiler_params=pltpu.CompilerParams(
            dimension_semantics=("parallel", "arbitrary"),
            vmem_limit_bytes=vmem_limit),
        cost_estimate=pl.CostEstimate(
            flops=3 * B * C * HW,
            transcendentals=2 * B * C,
            bytes_accessed=B * C * HW * itemsize + 4 * B * C + 2 * weight_bytes),
    )(x_flat, a1, b1p, a2, b2p)

    # Stage B: out = x * gate, lane-dense tiles, partial edge writes masked.
    out = pl.pallas_call(
        _scale_kernel,
        out_shape=jax.ShapeDtypeStruct((B, C, HW), x_flat.dtype),
        grid_spec=pltpu.PrefetchScalarGridSpec(
            num_scalar_prefetch=0,
            grid=(B, n_hw),
            in_specs=[pl.BlockSpec((None, C, tile_hw), lambda b, hw: (b, 0, hw)),
                      pl.BlockSpec((None, C, 1), lambda b, hw: (b, 0, 0))],
            out_specs=pl.BlockSpec((None, C, tile_hw), lambda b, hw: (b, 0, hw))),
        compiler_params=pltpu.CompilerParams(
            dimension_semantics=("parallel", "parallel"),
            vmem_limit_bytes=vmem_limit),
        cost_estimate=pl.CostEstimate(
            flops=B * C * HW,
            transcendentals=0,
            bytes_accessed=2 * B * C * HW * itemsize + 4 * B * C),
    )(x_flat, gate)

    return out.reshape(B, C, H, W)


# ---------------------------------------------------------------------------
# Pure-JAX reference (mirrors PyTorch forward with pool_types=['avg', 'max'])
# ---------------------------------------------------------------------------
def channel_gate_c_ref(x, params):
    w1, b1, w2, b2 = params                      # nn.Linear layout
    with jax.default_matmul_precision("float32"):
        x32 = x.astype(jnp.float32)

        def mlp(p):
            h = jnp.maximum(p @ w1.T + b1, 0.0)
            return h @ w2.T + b2

        avg = jnp.mean(x32, axis=(2, 3))
        mx = jnp.max(x32, axis=(2, 3))
        att = mlp(avg) + mlp(mx)
        scale = jax.nn.sigmoid(att)[:, :, None, None]
        return (x32 * scale).astype(x.dtype)


def init_params(key, gate_channels, reduction_ratio=16):
    """nn.Linear layout: w1 (Cr, C), b1 (Cr,), w2 (C, Cr), b2 (C,)."""
    C = gate_channels
    Cr = max(C // reduction_ratio, 1)
    k1, k2, k3, k4 = jax.random.split(key, 4)
    bound1 = 1.0 / np.sqrt(C)
    bound2 = 1.0 / np.sqrt(Cr)
    w1 = jax.random.uniform(k1, (Cr, C), jnp.float32, -bound1, bound1)
    b1 = jax.random.uniform(k2, (Cr,), jnp.float32, -bound1, bound1)
    w2 = jax.random.uniform(k3, (C, Cr), jnp.float32, -bound2, bound2)
    b2 = jax.random.uniform(k4, (C,), jnp.float32, -bound2, bound2)
    return (w1, b1, w2, b2)


if __name__ == "__main__":
    key = jax.random.PRNGKey(0)
    kx1, kx2, kx3, kp = jax.random.split(key, 4)

    C = 32                                       # gate_channels=32, r=16 -> hidden=2
    params = init_params(kp, gate_channels=C, reduction_ratio=16)

    # 1) Fused VMEM-resident path, 128-aligned spatial extent.
    x1 = jax.random.normal(kx1, (2, C, 16, 16), jnp.float32)
    o1 = jax.block_until_ready(channel_gate_c(x1, params))
    np.testing.assert_allclose(np.asarray(o1),
                               np.asarray(channel_gate_c_ref(x1, params)),
                               rtol=5e-4, atol=5e-4)

    # 2) Fused path, non-128-multiple spatial extent (HW = 63).
    x2 = jax.random.normal(kx2, (2, C, 7, 9), jnp.float32)
    o2 = jax.block_until_ready(channel_gate_c(x2, params))
    np.testing.assert_allclose(np.asarray(o2),
                               np.asarray(channel_gate_c_ref(x2, params)),
                               rtol=5e-4, atol=5e-4)

    # 3) Streaming path (forced): multi-tile HW reduction + tail masking.
    x3 = jax.random.normal(kx3, (1, C, 20, 20), jnp.float32)   # HW = 400
    o3 = jax.block_until_ready(
        channel_gate_c(x3, params, force_streaming=True, tile_hw=128))
    np.testing.assert_allclose(np.asarray(o3),
                               np.asarray(channel_gate_c_ref(x3, params)),
                               rtol=5e-4, atol=5e-4)

    # 4) bf16 activations streamed without an f32 HBM copy (fused path).
    xb = x1.astype(jnp.bfloat16)
    ob = jax.block_until_ready(channel_gate_c(xb, params))
    np.testing.assert_allclose(np.asarray(ob.astype(jnp.float32)),
                               np.asarray(channel_gate_c_ref(xb, params)
                                          .astype(jnp.float32)),
                               rtol=2e-2, atol=2e-2)

    print("KERNEL_OK")
</pallas_src>

<mosaic_0001>
module attributes {stable_mosaic.version = 11 : i64} {
  func.func @_fused_kernel(%arg0: i32, %arg1: memref<1x32x256xf32, #tpu.memory_space<vmem>>, %arg2: memref<32x128xf32, #tpu.memory_space<vmem>>, %arg3: memref<1x128xf32, #tpu.memory_space<vmem>>, %arg4: memref<32x128xf32, #tpu.memory_space<vmem>>, %arg5: memref<32x1xf32, #tpu.memory_space<vmem>>, %arg6: memref<1x32x256xf32, #tpu.memory_space<vmem>>) attributes {dimension_semantics = [#tpu.dimension_semantics<parallel>], iteration_bounds = array<i64: 2>, scalar_prefetch = 0 : i64, scratch_operands = 0 : i64, tpu.core_type = #tpu.core_type<tc>, window_params = [{transform_indices = @transform_0, window_bounds = array<i64: 1, 32, 256>}, {pipeline_mode = #tpu.pipeline_mode<synchronous>, transform_indices = @transform_1, window_bounds = array<i64: 32, 128>}, {pipeline_mode = #tpu.pipeline_mode<synchronous>, transform_indices = @transform_2, window_bounds = array<i64: 1, 128>}, {pipeline_mode = #tpu.pipeline_mode<synchronous>, transform_indices = @transform_3, window_bounds = array<i64: 32, 128>}, {pipeline_mode = #tpu.pipeline_mode<synchronous>, transform_indices = @transform_4, window_bounds = array<i64: 32, 1>}, {transform_indices = @transform_5, window_bounds = array<i64: 1, 32, 256>}]} {
    %c0 = arith.constant 0 : index
    %c0_0 = arith.constant 0 : index
    %c0_1 = arith.constant 0 : index
    %0 = vector.load %arg1[%c0, %c0_0, %c0_1] : memref<1x32x256xf32, #tpu.memory_space<vmem>>, vector<1x32x256xf32>
    %1 = vector.shape_cast %0 : vector<1x32x256xf32> to vector<32x256xf32>
    %cst = arith.constant dense<0.000000e+00> : vector<32xf32>
    %2 = vector.multi_reduction <add>, %1, %cst [1] : vector<32x256xf32> to vector<32xf32>
    %3 = vector.shape_cast %2 : vector<32xf32> to vector<32x1xf32>
    %cst_2 = arith.constant dense<0xFF800000> : vector<32xf32>
    %4 = vector.multi_reduction <maximumf>, %1, %cst_2 [1] : vector<32x256xf32> to vector<32xf32>
    %5 = vector.shape_cast %4 : vector<32xf32> to vector<32x1xf32>
    %cst_3 = arith.constant 3.906250e-03 : f32
    %6 = vector.broadcast %cst_3 : f32 to vector<32x1xf32>
    %7 = arith.mulf %3, %6 : vector<32x1xf32>
    %c0_4 = arith.constant 0 : index
    %c0_5 = arith.constant 0 : index
    %8 = vector.load %arg2[%c0_4, %c0_5] : memref<32x128xf32, #tpu.memory_space<vmem>>, vector<32x128xf32>
    %c0_6 = arith.constant 0 : index
    %c0_7 = arith.constant 0 : index
    %9 = vector.load %arg3[%c0_6, %c0_7] : memref<1x128xf32, #tpu.memory_space<vmem>>, vector<1x128xf32>
    %c0_8 = arith.constant 0 : index
    %c0_9 = arith.constant 0 : index
    %10 = vector.load %arg4[%c0_8, %c0_9] : memref<32x128xf32, #tpu.memory_space<vmem>>, vector<32x128xf32>
    %c0_10 = arith.constant 0 : index
    %c0_11 = arith.constant 0 : index
    %11 = vector.load %arg5[%c0_10, %c0_11] : memref<32x1xf32, #tpu.memory_space<vmem>>, vector<32x1xf32>
    %12 = vector.broadcast %7 : vector<32x1xf32> to vector<32x128xf32>
    %13 = arith.mulf %8, %12 : vector<32x128xf32>
    %cst_12 = arith.constant dense<0.000000e+00> : vector<128xf32>
    %14 = vector.multi_reduction <add>, %13, %cst_12 [0] : vector<32x128xf32> to vector<128xf32>
    %15 = vector.shape_cast %14 : vector<128xf32> to vector<1x128xf32>
    %16 = arith.addf %15, %9 : vector<1x128xf32>
    %cst_13 = arith.constant 0.000000e+00 : f32
    %17 = vector.broadcast %cst_13 : f32 to vector<1x128xf32>
    %18 = arith.maximumf %16, %17 : vector<1x128xf32>
    %19 = vector.broadcast %18 : vector<1x128xf32> to vector<32x128xf32>
    %20 = arith.mulf %10, %19 : vector<32x128xf32>
    %cst_14 = arith.constant dense<0.000000e+00> : vector<32xf32>
    %21 = vector.multi_reduction <add>, %20, %cst_14 [1] : vector<32x128xf32> to vector<32xf32>
    %22 = vector.shape_cast %21 : vector<32xf32> to vector<32x1xf32>
    %23 = arith.addf %22, %11 : vector<32x1xf32>
    %24 = vector.broadcast %5 : vector<32x1xf32> to vector<32x128xf32>
    %25 = arith.mulf %8, %24 : vector<32x128xf32>
    %cst_15 = arith.constant dense<0.000000e+00> : vector<128xf32>
    %26 = vector.multi_reduction <add>, %25, %cst_15 [0] : vector<32x128xf32> to vector<128xf32>
    %27 = vector.shape_cast %26 : vector<128xf32> to vector<1x128xf32>
    %28 = arith.addf %27, %9 : vector<1x128xf32>
    %cst_16 = arith.constant 0.000000e+00 : f32
    %29 = vector.broadcast %cst_16 : f32 to vector<1x128xf32>
    %30 = arith.maximumf %28, %29 : vector<1x128xf32>
    %31 = vector.broadcast %30 : vector<1x128xf32> to vector<32x128xf32>
    %32 = arith.mulf %10, %31 : vector<32x128xf32>
    %cst_17 = arith.constant dense<0.000000e+00> : vector<32xf32>
    %33 = vector.multi_reduction <add>, %32, %cst_17 [1] : vector<32x128xf32> to vector<32xf32>
    %34 = vector.shape_cast %33 : vector<32xf32> to vector<32x1xf32>
    %35 = arith.addf %34, %11 : vector<32x1xf32>
    %36 = arith.addf %23, %35 : vector<32x1xf32>
    %cst_18 = arith.constant 0.000000e+00 : f32
    %37 = vector.broadcast %cst_18 : f32 to vector<32x1xf32>
    %38 = arith.subf %37, %36 : vector<32x1xf32>
    %39 = math.exp %38 : vector<32x1xf32>
    %cst_19 = arith.constant 1.000000e+00 : f32
    %40 = vector.broadcast %cst_19 : f32 to vector<32x1xf32>
    %41 = arith.addf %40, %39 : vector<32x1xf32>
    %cst_20 = arith.constant 1.000000e+00 : f32
    %42 = vector.broadcast %cst_20 : f32 to vector<32x1xf32>
    %43 = arith.divf %42, %41 : vector<32x1xf32>
    %44 = vector.broadcast %43 : vector<32x1xf32> to vector<32x256xf32>
    %45 = arith.mulf %1, %44 : vector<32x256xf32>
    %c0_21 = arith.constant 0 : index
    %c0_22 = arith.constant 0 : index
    %c0_23 = arith.constant 0 : index
    %46 = vector.load %arg6[%c0_21, %c0_22, %c0_23] : memref<1x32x256xf32, #tpu.memory_space<vmem>>, vector<1x32x256xf32>
    %47 = vector.shape_cast %46 : vector<1x32x256xf32> to vector<32x256xf32>
    %48 = vector.shape_cast %45 : vector<32x256xf32> to vector<1x32x256xf32>
    tpu.vector_store %arg6[%c0_21, %c0_22, %c0_23], %48 {strides = array<i32>} : memref<1x32x256xf32, #tpu.memory_space<vmem>>, vector<1x32x256xf32>,
    return
  }
  func.func @transform_0(%arg0: i32) -> (i32, i32, i32) {
    %c0_i32 = arith.constant 0 : i32
    %c0_i32_0 = arith.constant 0 : i32
    %c0_i32_1 = arith.constant 0 : i32
    return %arg0, %c0_i32, %c0_i32_0 : i32, i32, i32
  }
  func.func @transform_1(%arg0: i32) -> (i32, i32) {
    %c0_i32 = arith.constant 0 : i32
    %c0_i32_0 = arith.constant 0 : i32
    %c0_i32_1 = arith.constant 0 : i32
    return %c0_i32, %c0_i32_0 : i32, i32
  }
  func.func @transform_2(%arg0: i32) -> (i32, i32) {
    %c0_i32 = arith.constant 0 : i32
    %c0_i32_0 = arith.constant 0 : i32
    %c0_i32_1 = arith.constant 0 : i32
    return %c0_i32, %c0_i32_0 : i32, i32
  }
  func.func @transform_3(%arg0: i32) -> (i32, i32) {
    %c0_i32 = arith.constant 0 : i32
    %c0_i32_0 = arith.constant 0 : i32
    %c0_i32_1 = arith.constant 0 : i32
    return %c0_i32, %c0_i32_0 : i32, i32
  }
  func.func @transform_4(%arg0: i32) -> (i32, i32) {
    %c0_i32 = arith.constant 0 : i32
    %c0_i32_0 = arith.constant 0 : i32
    %c0_i32_1 = arith.constant 0 : i32
    return %c0_i32, %c0_i32_0 : i32, i32
  }
  func.func @transform_5(%arg0: i32) -> (i32, i32, i32) {
    %c0_i32 = arith.constant 0 : i32
    %c0_i32_0 = arith.constant 0 : i32
    %c0_i32_1 = arith.constant 0 : i32
    return %arg0, %c0_i32, %c0_i32_0 : i32, i32, i32
  }
}

</mosaic_0001>

<bundles_post_ra>
// kernel: tpu_custom_call.1
= control target key start
LH: loop header
LB: loop body
LE: loop exit
PB: predicated region body
PF: predicated region fallthrough
CT: control target
= control target key end

     0   :  { %10 = vsyncpa [#allocation3], 0  ;;  %s1080_s0 = inlined_call_operand.hbm [shape: f32[2,32,256], index: 0, kind: input, shape index: {}]   ;;  %s1081_s1 = inlined_call_operand.vmem [shape: f32[32,128], index: 1, kind: input, shape index: {}]   ;;  %s1082_s2 = inlined_call_operand.vmem [shape: f32[1,128], index: 2, kind: input, shape index: {}]   ;;  %s1083_s3 = inlined_call_operand.hbm [shape: f32[32,128], index: 3, kind: input, shape index: {}]   ;;  %s1084_s4 = inlined_call_operand.vmem [shape: f32[32,1], index: 4, kind: input, shape index: {}]   ;;  %s1085_s5 = inlined_call_operand.hbm [shape: f32[2,32,256], index: 5, kind: output, shape index: {}]  }
   0x1   :  { %12 = vsyncpa [#allocation3 + $0x1], 0 }
   0x2   :  { %13 = vsyncpa [#allocation6], 0 }
   0x3   :  { %14 = vsyncpa [#allocation4], 0 }
   0x4   :  { %16 = vsyncpa [#allocation4 + $0x1], 0  ;;  %s808_s18 = smov 0   ;;  %s810_s19 = smov 0  }
   0x5   :  { %s812_s20 = smov 0   ;;  %s814_s21 = smov 0  }
   0x6 LB: > { %s829_s22 = sadd.s32 4294967295, %s766_s21   ;;  %s538_s23 = sadd.s32 4294967294, %s766_s21   ;;  %s766_s21 = sphi %s814_s21, %s1105_s21   ;;  %s762_s20 = sphi %s812_s20, %s1104_s20   ;;  %s758_s19 = sphi %s810_s19, %s1103_s19   ;;  %s754_s18 = sphi %s808_s18, %s1102_s18  }
   0x7   : > { %p42_p0 = scmp.ne.s32.totalorder %s758_s19, %s754_s18  ;;  %p1086_p1 = scmp.eq.s32.totalorder %s829_s22, 0 }
   0x8   : > { %p156_p3 = scmp.eq.s32.totalorder %s538_s23, 1  ;;  %p539_p5 = scmp.ge.s32.totalorder %s766_s21, 1 }
   0x9   : > { %p838_p4 = por %p1086_p1, %p42_p0  ;;  %p163_p7 = scmp.lt.s32.totalorder %s766_s21, 3 }
   0xa   : > { %p843_p6 = por %p156_p3, %p42_p0  ;;  %s768_s27 = smov [#allocation5]  }
   0xb   : > { %s1089_s24 = scalar_select %p838_p4, 1, 0 }
   0xc   : > { %s1090_s25 = scalar_select %p843_p6, 1, 0 }
   0xd   : > { %p848_p8 = pnand %p539_p5, %p163_p7  ;;  %s181_s28 = sshll.u32 %s768_s27, 4  ;;  %s852_s28 = int_to_ptr.vmem [resolvable:$true] %s181_s28 }
   0xe   : > { %s864_s30 = sadd.s32 1, %s766_s21   ;;  %s29_s6 = sadd.s32 1, %s762_s20 }
   0xf   : > { %s1091_s26 = scalar_select %p848_p8, 1, 0 }
  0x10   : > { %p564_p9 = pneg %p848_p8  ;;  %s26_s7 = ssub.s32 %s766_s21, %s864_s30 }
  0x11   : > { %s638_s10 = scalar_lea.hbm %s1083_s3, 512 }
  0x12   : > { %p859_p11 = pnand %p564_p9, %p1086_p1  ;;  %p639_p12 = scmp.ne.s32.totalorder %s1083_s3, %s638_s10 }
  0x13   : > { %p645_p5 = scmp.lt.u32.totalorder %s638_s10, %s1083_s3 }
  0x14   : > { %p640_p13 = pneg %p859_p11 }
  0x16   : > { %p641_p0 = pnand %p640_p13, %p639_p12 }
  0x18   : > { %p642_p3 = pneg %p641_p0 }
  0x1a   : > { %p647_p7 = pnand %p645_p5, %p642_p3 }
  0x1c   : > { %650 = shalt.err (!%p647_p7)
}
  0x1d   : > { %s651_s15 = scalar_lea.vmem %s852_s28, 512  ;;  %p659_p2 = scmp.lt.s32.totalorder %s852_s28, %s852_s28 }
  0x1e   : > { %p652_p9 = scmp.ne.s32.totalorder %s852_s28, %s651_s15  ;;  %p660_p6 = scmp.lt.s32.totalorder %s651_s15, %s651_s15 }
  0x20   : > { %p654_p10 = pnand %p652_p9, %p640_p13  ;;  %p661_p4 = por %p660_p6, %p659_p2 }
  0x22   : > { %p655_p1 = pneg %p654_p10 }
  0x24   : > { %p662_p8 = pnand %p661_p4, %p655_p1 }
  0x26   : > { %665 = shalt.err (!%p662_p8)
}
  0x27   : > { %s769_s16 = smov 128   ;;  %s770_s17 = smov 8  }
  0x28   : > { %567 = dma.hbm_to_vmem [thread:$0]  (!%p859_p11), %s1083_s3, 512, %s852_s28, [#allocation6], %s769_s16, %s769_s16, %s770_s17  }
  0x29   : > { %p27_p2 = scmp.eq.s32.totalorder %s26_s7, 0  ;;  %p36_p1 = scmp.ne.s32.totalorder %s762_s20, %s758_s19 }
  0x2a   : > { %p37_p4 = scmp.eq.s32.totalorder %s766_s21, 0  ;;  %p577_p6 = scmp.lt.s32.totalorder %s766_s21, 2 }
  0x2b   : > { %s895_s8 = scalar_select %p27_p2, %s762_s20, %s29_s6  }
  0x2c   : > { %p38_p8 = por %p37_p4, %p36_p1  ;;  %p1093_p10 = scmp.eq.s32.totalorder %s829_s22, 1 }
  0x2d   : > { %s198_s10 = sand.u32 1, %s762_s20   ;;  %s554_s11 = sshll.u32 %s766_s21, 10 }
  0x2e   : > { %p899_p12 = por %p1093_p10, %p36_p1  ;;  %s542_s12 = sshll.u32 %s198_s10, 6 }
  0x2f   : > { %s908_s14 = scalar_lea.hbm %s1080_s0, %s554_s11  ;;  %s202_s28 = scalar_lea.vmem [#allocation2], %s542_s12 }
  0x30   : > { %s209_s6 = sshll.u32 %s202_s28, 4  ;;  %p910_p11 = pnand %p577_p6, %p38_p8  ;;  %s914_s6 = int_to_ptr.vmem [resolvable:$true] %s209_s6 }
  0x31   : > { %s916_s15 = scalar_lea.sflag [#allocation3], %s198_s10  ;;  %s666_s16 = scalar_lea.hbm %s908_s14, 1024 }
  0x32   : > { %p667_p13 = scmp.ne.s32.totalorder %s908_s14, %s666_s16  ;;  %p668_p0 = pneg %p910_p11 }
  0x33   : > { %s671_s27 = scalar_lea.hbm %s1080_s0, 2048  ;;  %p672_p7 = scmp.lt.u32.totalorder %s908_s14, %s1080_s0 }
  0x34   : > { %p669_p3 = pnand %p668_p0, %p667_p13  ;;  %p673_p9 = scmp.lt.u32.totalorder %s671_s27, %s666_s16 }
  0x35   : > { %p675_p1 = scmp.lt.u32.totalorder %s666_s16, %s908_s14 }
  0x36   : > { %p670_p5 = pneg %p669_p3  ;;  %p674_p2 = por %p673_p9, %p672_p7 }
  0x38   : > { %p676_p4 = por %p675_p1, %p674_p2 }
  0x3a   : > { %p677_p6 = pnand %p676_p4, %p670_p5 }
  0x3c   : > { %680 = shalt.err (!%p677_p6)
}
  0x3d   : > { %s681_s10 = scalar_lea.vmem %s914_s6, 1024  ;;  %s771_s29 = smov [#allocation2]  }
  0x3e   : > { %p682_p8 = scmp.ne.s32.totalorder %s914_s6, %s681_s10  ;;  %s686_s13 = sshll.u32 %s771_s29, 4  ;;  %s687_s13 = int_to_ptr.vmem [resolvable:$false] %s686_s13 }
  0x3f   : > { %s688_s28 = scalar_lea.vmem %s687_s13, 2048  ;;  %p689_p3 = scmp.lt.s32.totalorder %s914_s6, %s687_s13 }
  0x40   : > { %p684_p10 = pnand %p682_p8, %p668_p0  ;;  %p690_p7 = scmp.lt.s32.totalorder %s688_s28, %s681_s10 }
  0x42   : > { %p685_p13 = pneg %p684_p10  ;;  %p691_p9 = por %p690_p7, %p689_p3 }
  0x44   : > { %p692_p2 = pnand %p691_p9, %p685_p13 }
  0x46   : > { %695 = shalt.err (!%p692_p2)
}
  0x47   : > { %s772_s16 = smov 256   ;;  %s773_s17 = smov 16  }
  0x48   : > { %571 = dma.hbm_to_vmem [thread:$0]  (!%p910_p11), %s908_s14, 1024, %s914_s6, %s916_s15, %s772_s16, %s772_s16, %s773_s17  }
  0x49   : > { %p1096_p0 = scmp.ne.s32.totalorder %s1091_s26, 0 }
  0x4a   : > { %s947_s23 = sand.u32 (!%p1096_p0), 1, %s758_s19   ;;  %p1097_p5 = scmp.ne.s32.totalorder (!%p1096_p0), %s1089_s24, 0 }
  0x4b   : > { %221 = sbr.rel (%p1096_p0) target bundleno = 606 (0x25e), region = 40  ;;  %s546_s27 = sshll.u32 (!%p1096_p0), %s947_s23, 6 }
  0x4c   : > { %s224_s11 = scalar_lea.sflag (!%p1096_p0), [#allocation3], %s947_s23  ;;  %s227_s12 = scalar_lea.vmem (!%p1096_p0), [#allocation2], %s546_s27 }
  0x52   : > { %741 = dma.done.wait (%p1097_p5), %s224_s11, 1024  }
  0x53   : > { %743 = vsyncadd (%p1097_p5), %s224_s11, 4294966272  ;;  %p1098_p11 = scmp.eq.s32.totalorder %s829_s22, 0 }
  0x55   : > { %745 = dma.done.wait (%p1098_p11), [#allocation6], 512   ;;  %p1099_p1 = pmov %p1098_p11 }
  0x56   : > { %v961_v0 = vld [vmem:[%s227_s12 + $0x20] sm:$0xff]  ;;  %v963_v1 = vld [vmem:[%s227_s12 + $0x28] sm:$0xff]  ;;  %v971_v5 = vld [vmem:[%s227_s12 + $0x10] sm:$0xff]  ;;  %v322_v56 = vlaneseq  ;;  %s257_s7 = scalar_lea.vmem [#allocation7], %s546_s27  ;;  %s555_s10 = sshll.u32 %s829_s22, 10 }
  0x57   : > { %747 = vsyncadd (%p1099_p1), [#allocation6], 4294966784  ;;  %v965_v2 = vld [vmem:[%s227_s12] sm:$0xff]  ;;  %v272_v3 = vadd.f32 %v963_v1, %v961_v0  ;;  %v969_v4 = vld [vmem:[%s227_s12 + $0x8] sm:$0xff]  ;;  %v284_v15 = vmax.f32 %v961_v0, %v963_v1  ;;  %s455_s15 = sshll.u32 %s257_s7, 4  ;;  %s1034_s13 = scalar_lea.hbm %s1085_s5, %s555_s10  ;;  %s1029_s15 = int_to_ptr.vmem [resolvable:$true] %s455_s15 }
  0x58   : > { %v973_v6 = vld [vmem:[%s227_s12 + $0x18] sm:$0xff]  ;;  %v266_v7 = vadd.f32 %v969_v4, %v965_v2  ;;  %v278_v8 = vmax.f32 %v965_v2, %v969_v4  ;;  %v981_v10 = vld [vmem:[%s227_s12 + $0x30] sm:$0xff]  ;;  %v294_v20 = vld [vmem:[%s1081_s1] sm:$0xff]  ;;  %v323_v60 = vshrl.u32 %v322_v56, 7  ;;  %s442_s22 = scalar_lea.sflag [#allocation4], %s947_s23  ;;  %s696_s28 = scalar_lea.vmem %s1029_s15, 1024 }
  0x59   : > { %273 = vadd.xlane.f32.xlu1 %v272_v3  ;;  %v269_v9 = vadd.f32 %v973_v6, %v971_v5  ;;  %v983_v11 = vld [vmem:[%s227_s12 + $0x38] sm:$0xff]  ;;  %v281_v13 = vmax.f32 %v971_v5, %v973_v6  ;;  %v295_v22 = vld [vmem:[%s1081_s1 + $0x8] sm:$0xff]  ;;  %v296_v25 = vld [vmem:[%s1081_s1 + $0x10] sm:$0xff]  ;;  %p697_p4 = scmp.ne.s32.totalorder %s1029_s15, %s696_s28  ;;  %s775_s16 = smov [#allocation7]  }
  0x5a   : > { %267 = vadd.xlane.f32.xlu0 %v266_v7  ;;  %v275_v12 = vadd.f32 %v983_v11, %v981_v10  ;;  %v287_v14 = vmax.f32 %v981_v10, %v983_v11  ;;  %v297_v29 = vld [vmem:[%s1081_s1 + $0x18] sm:$0xff]  ;;  %v298_v57 = vld [vmem:[%s1082_s2] sm:$0x1]  ;;  %v324_v3 = vsub.s32 0, %v323_v60  ;;  %s700_s17 = sshll.u32 %s775_s16, 4  ;;  %s701_s17 = int_to_ptr.vmem [resolvable:$false] %s700_s17 }
  0x5b   : > { %p698_p6 = pnand %p697_p4, %p899_p12  ;;  %s702_s11 = scalar_lea.vmem %s701_s17, 2048 }
  0x5c   : > { %p703_p10 = scmp.lt.s32.totalorder %s1029_s15, %s701_s17  ;;  %p704_p13 = scmp.lt.s32.totalorder %s702_s11, %s696_s28 }
  0x5d   : > { %279 = vmax.xlane.f32.xlu1 %v278_v8  ;;  %p699_p8 = pneg %p698_p6 }
  0x5e   : > { %270 = vadd.xlane.f32.xlu0 %v269_v9  ;;  %v300_v9 = vld [vmem:[#allocation5 + $0x8] sm:$0xff]  ;;  %p705_p3 = por %p704_p13, %p703_p10 }
  0x60   : > { %p706_p7 = pnand %p705_p3, %p699_p8 }
  0x61   : > { %276 = vadd.xlane.f32.xlu1 %v275_v12  ;;  %v299_v12 = vld [vmem:[#allocation5] sm:$0xff] }
  0x62   : > { %282 = vmax.xlane.f32.xlu0 %v281_v13 }
  0x65   : > { %288 = vmax.xlane.f32.xlu1 %v287_v14 }
  0x66   : > { %285 = vmax.xlane.f32.xlu0 %v284_v15 }
  0xe6   : > { %v274_v16 = vpop.xlane.xlu1 %273 }
  0xe7   : > { %v268_v17 = vpop.xlane.xlu0 %267  ;;  %v292_v23 = vmul.f32 0.00390625, %v274_v16 }
  0xe8   : > { %v290_v18 = vmul.f32 0.00390625, %v268_v17 }
  0xe9   : > { %v309_v34 = vmul.f32 %v296_v25, %v292_v23 }
  0xea   : > { %v280_v19 = vpop.xlane.xlu1 %279  ;;  %v307_v26 = vmul.f32 %v294_v20, %v290_v18  ;;  %v302_v18 = vld [vmem:[#allocation5 + $0x18] sm:$0xff] }
  0xeb   : > { %v271_v21 = vpop.xlane.xlu0 %270  ;;  %v342_v36 = vmul.f32 %v294_v20, %v280_v19  ;;  %v301_v19 = vld [vmem:[#allocation5 + $0x10] sm:$0xff] }
  0xec   : > { %v291_v24 = vmul.f32 0.00390625, %v271_v21 }
  0xee   : > { %v277_v27 = vpop.xlane.xlu1 %276  ;;  %v308_v28 = vmul.f32 %v295_v22, %v291_v24  ;;  %v774_v24 = vmov 0  }
  0xef   : > { %v293_v30 = vmul.f32 0.00390625, %v277_v27  ;;  %v283_v31 = vpop.xlane.xlu0 %282  ;;  %621 = vset.pattern.permute.xlu1 %v774_v24  ;;  %620 = vset.pattern.permute.xlu0 %v774_v24  ;;  %v304_v27 = vld [vmem:[%s1084_s4 + $0x8] sm:$0xff] }
  0xf0   : > { %v311_v32 = vadd.f32 %v308_v28, %v307_v26  ;;  %v343_v33 = vmul.f32 %v295_v22, %v283_v31  ;;  %v303_v28 = vld [vmem:[%s1084_s4] sm:$0xff] }
  0xf1   : > { %v310_v35 = vmul.f32 %v297_v29, %v293_v30 }
  0xf2   : > { %v312_v37 = vadd.f32 %v311_v32, %v309_v34  ;;  %v289_v38 = vpop.xlane.xlu1 %288  ;;  %v346_v40 = vadd.f32 %v343_v33, %v342_v36 }
  0xf3   : > { %v286_v39 = vpop.xlane.xlu0 %285  ;;  %v345_v43 = vmul.f32 %v297_v29, %v289_v38 }
  0xf4   : > { %v344_v41 = vmul.f32 %v296_v25, %v286_v39  ;;  %v313_v42 = vadd.f32 %v312_v37, %v310_v35 }
  0xf6   : > { %v347_v44 = vadd.f32 %v346_v40, %v344_v41  ;;  %v314_v45 = vrot.slane %v313_v42, 4  ;;  %v306_v41 = vld [vmem:[%s1084_s4 + $0x18] sm:$0xff] }
  0xf8   : > { %v315_v46 = vadd.f32 %v314_v45, %v313_v42  ;;  %v348_v47 = vadd.f32 %v347_v44, %v345_v43  ;;  %v305_v42 = vld [vmem:[%s1084_s4 + $0x10] sm:$0xff] }
  0xfa   : > { %v316_v48 = vrot.slane %v315_v46, 2  ;;  %v349_v49 = vrot.slane %v348_v47, 4 }
  0xfc   : > { %v317_v50 = vadd.f32 %v316_v48, %v315_v46  ;;  %v350_v51 = vadd.f32 %v349_v49, %v348_v47 }
  0xfe   : > { %v318_v52 = vrot.slane %v317_v50, 1  ;;  %v351_v53 = vrot.slane %v350_v51, 2 }
 0x100   : > { %v319_v54 = vadd.f32 %v318_v52, %v317_v50  ;;  %v352_v55 = vadd.f32 %v351_v53, %v350_v51 }
 0x102   : > { %v353_v58 = vrot.slane %v352_v55, 1  ;;  %v320_v61 = vadd.f32 %v319_v54, %v298_v57 }
 0x104   : > { %v354_v59 = vadd.f32 %v353_v58, %v352_v55  ;;  %v321_v7 = vmax.f32 %v320_v61, 0.0 }
 0x106   : > { %v355_v62 = vadd.f32 %v354_v59, %v298_v57  ;;  %v325_v15 = vrot.slane %v321_v7, %v324_v3 }
 0x108   : > { %v356_v63 = vmax.f32 %v355_v62, 0.0  ;;  %v327_v16 = vmul.f32 %v325_v15, %v300_v9  ;;  %v326_v17 = vmul.f32 %v325_v15, %v299_v12  ;;  %v329_v20 = vmul.f32 %v325_v15, %v302_v18 }
 0x109   : > { %v328_v21 = vmul.f32 %v325_v15, %v301_v19 }
 0x10a   : > { %v360_v8 = vrot.slane %v356_v63, %v324_v3 }
 0x10c   : > { %v362_v13 = vmul.f32 %v360_v8, %v300_v9  ;;  %v361_v14 = vmul.f32 %v360_v8, %v299_v12  ;;  %v364_v22 = vmul.f32 %v360_v8, %v302_v18  ;;  %v363_v23 = vmul.f32 %v360_v8, %v301_v19 }
 0x10e   : > { %367 = vadd.xlane.f32.xlu1 %v362_v13  ;;  %365 = vadd.xlane.f32.xlu0 %v361_v14 }
 0x112   : > { %332 = vadd.xlane.f32.xlu1 %v327_v16  ;;  %330 = vadd.xlane.f32.xlu0 %v326_v17 }
 0x116   : > { %336 = vadd.xlane.f32.xlu1 %v329_v20  ;;  %334 = vadd.xlane.f32.xlu0 %v328_v21 }
 0x11a   : > { %371 = vadd.xlane.f32.xlu1 %v364_v22  ;;  %369 = vadd.xlane.f32.xlu0 %v363_v23 }
 0x19b   : > { %v368_v25 = vpop.xlane.xlu1 %367  ;;  %v366_v26 = vpop.xlane.xlu0 %365 }
 0x19c   : > { %v374_v31 = vadd.f32 %v368_v25, %v304_v27  ;;  %v373_v32 = vadd.f32 %v366_v26, %v303_v28 }
 0x19f   : > { %v333_v29 = vpop.xlane.xlu1 %332  ;;  %v331_v30 = vpop.xlane.xlu0 %330 }
 0x1a0   : > { %v339_v33 = vadd.f32 %v333_v29, %v304_v27  ;;  %v338_v34 = vadd.f32 %v331_v30, %v303_v28 }
 0x1a2   : > { %v378_v35 = vadd.f32 %v374_v31, %v339_v33  ;;  %v377_v36 = vadd.f32 %v373_v32, %v338_v34 }
 0x1a3   : > { %v337_v37 = vpop.xlane.xlu1 %336  ;;  %v335_v38 = vpop.xlane.xlu0 %334 }
 0x1a4   : > { %v382_v39 = vsub.f32 0.0, %v378_v35  ;;  %v381_v40 = vsub.f32 0.0, %v377_v36  ;;  %v341_v45 = vadd.f32 %v337_v37, %v306_v41  ;;  %v340_v48 = vadd.f32 %v335_v38, %v305_v42 }
 0x1a6   : > { %v387_v43 = vmul.f32 1.442695, %v382_v39  ;;  %v385_v44 = vmul.f32 1.442695, %v381_v40 }
 0x1a7   : > { %v372_v46 = vpop.xlane.xlu1 %371  ;;  %v370_v47 = vpop.xlane.xlu0 %369 }
 0x1a8   : > { %622 = vpow2.f32 %v387_v43  ;;  %v376_v49 = vadd.f32 %v372_v46, %v306_v41  ;;  %v375_v50 = vadd.f32 %v370_v47, %v305_v42 }
 0x1a9   : > { %624 = vpow2.f32 %v385_v44 }
 0x1aa   : > { %v380_v51 = vadd.f32 %v376_v49, %v341_v45  ;;  %v379_v52 = vadd.f32 %v375_v50, %v340_v48 }
 0x1ac   : > { %v384_v53 = vsub.f32 0.0, %v380_v51  ;;  %v383_v54 = vsub.f32 0.0, %v379_v52 }
 0x1ae   : > { %v391_v55 = vmul.f32 1.442695, %v384_v53  ;;  %v389_v56 = vmul.f32 1.442695, %v383_v54 }
 0x1b0   : > { %626 = vpow2.f32 %v391_v55 }
 0x1b1   : > { %628 = vpow2.f32 %v389_v56 }
 0x1b2   : > { %v623_v57 = vpop.eup %622 }
 0x1b3   : > { %v625_v58 = vpop.eup %624  ;;  %v394_v59 = vadd.f32 1.0, %v623_v57 }
 0x1b4   : > { %v393_v60 = vadd.f32 1.0, %v625_v58 }
 0x1b5   : > { %630 = vrcp.f32 %v394_v59 }
 0x1b6   : > { %632 = vrcp.f32 %v393_v60 }
 0x1ba   : > { %v627_v61 = vpop.eup %626 }
 0x1bb   : > { %v629_v62 = vpop.eup %628  ;;  %v396_v3 = vadd.f32 1.0, %v627_v61 }
 0x1bc   : > { %v395_v63 = vadd.f32 1.0, %v629_v62 }
 0x1be   : > { %634 = vrcp.f32 %v395_v63 }
 0x1bf   : > { %v631_v7 = vpop.eup %630  ;;  %636 = vrcp.f32 %v396_v3 }
 0x1c0   : > { %v633_v8 = vpop.eup %632  ;;  %412 = vperm.xlu1 %621, %v631_v7  }
 0x1c1   : > { %407 = vperm.xlu0 %620, %v633_v8  }
 0x1c8   : > { %v635_v9 = vpop.eup %634 }
 0x1c9   : > { %417 = vperm.xlu1 %621, %v635_v9   ;;  %v637_v12 = vpop.eup %636 }
 0x1cd   : > { %422 = vperm.xlu1 %621, %v637_v12  }
 0x23f   : > { %v413_v13 = vpop.permute.xlu1 %412 }
 0x240   : > { %v427_v14 = vmul.f32 %v413_v13, %v971_v5  ;;  %v428_v15 = vmul.f32 %v413_v13, %v973_v6  ;;  %v408_v16 = vpop.permute.xlu0 %407 }
 0x241   : > { %v425_v17 = vmul.f32 %v408_v16, %v965_v2  ;;  %v426_v18 = vmul.f32 %v408_v16, %v969_v4 }
 0x242   : > { %435 = vst [vmem:[%s257_s7 + $0x10] sm:$0xff] %v427_v14  ;;  %436 = vst [vmem:[%s257_s7 + $0x18] sm:$0xff] %v428_v15 }
 0x243   : > { %433 = vst [vmem:[%s257_s7] sm:$0xff] %v425_v17  ;;  %434 = vst [vmem:[%s257_s7 + $0x8] sm:$0xff] %v426_v18 }
 0x248   : > { %v418_v19 = vpop.permute.xlu1 %417 }
 0x249   : > { %v429_v20 = vmul.f32 %v418_v19, %v961_v0  ;;  %v430_v5 = vmul.f32 %v418_v19, %v963_v1 }
 0x24b   : > { %437 = vst [vmem:[%s257_s7 + $0x20] sm:$0xff] %v429_v20  ;;  %438 = vst [vmem:[%s257_s7 + $0x28] sm:$0xff] %v430_v5 }
 0x24c   : > { %v423_v2 = vpop.permute.xlu1 %422 }
 0x24d   : > { %v431_v4 = vmul.f32 %v423_v2, %v981_v10  ;;  %v432_v0 = vmul.f32 %v423_v2, %v983_v11 }
 0x24f   : > { %439 = vst [vmem:[%s257_s7 + $0x30] sm:$0xff] %v431_v4  ;;  %440 = vst [vmem:[%s257_s7 + $0x38] sm:$0xff] %v432_v0 }
 0x250   : > { %709 = shalt.err (!%p706_p7)
}
 0x251   : > { %s710_s12 = scalar_lea.hbm %s1034_s13, 1024  ;;  %s714_s14 = scalar_lea.hbm %s1085_s5, 2048 }
 0x252   : > { %p711_p9 = scmp.ne.s32.totalorder %s1034_s13, %s710_s12  ;;  %p715_p5 = scmp.lt.u32.totalorder %s1034_s13, %s1085_s5 }
 0x253   : > { %p716_p11 = scmp.lt.u32.totalorder %s714_s14, %s710_s12  ;;  %p718_p4 = scmp.lt.u32.totalorder %s710_s12, %s1034_s13 }
 0x254   : > { %p712_p2 = pnand %p711_p9, %p899_p12 }
 0x255   : > { %p717_p1 = por %p716_p11, %p715_p5 }
 0x256   : > { %p713_p0 = pneg %p712_p2 }
 0x257   : > { %p719_p6 = por %p718_p4, %p717_p1 }
 0x259   : > { %p720_p8 = pnand %p719_p6, %p713_p0 }
 0x25b   : > { %723 = shalt.err (!%p720_p8)
}
 0x25c   : > { %s776_s10 = smov 256   ;;  %s777_s27 = smov 16  }
 0x25d   : > { %562 = dma.vmem_to_hbm [thread:$0]  (%p899_p12), %s1029_s15, 1024, %s1034_s13, %s442_s22, %s776_s10, %s776_s10, %s777_s27  }
 0x25e PF: > { %s470_s29 = sand.u32 1, %s754_s18   ;;  %p1100_p10 = scmp.ne.s32.totalorder %s1090_s25, 0 }
 0x25f   : > { %p1101_p13 = scmp.ge.s32.totalorder %s766_s21, 2  ;;  %s471_s28 = scalar_lea.sflag [#allocation4], %s470_s29 }
 0x261   : > { %p573_p3 = pnand %p1101_p13, %p1100_p10 }
 0x263   : > { %749 = dma.done.wait (!%p573_p3), %s471_s28, 1024  }
 0x264   : > { %751 = vsyncadd (!%p573_p3), %s471_s28, 4294966272  ;;  %p19_p7 = scmp.ge.s32.totalorder %s864_s30, 4   ;;  %s1102_s18 = smov %s758_s19 }
 0x265   : > { %s1103_s19 = smov %s762_s20  ;;  %s1104_s20 = smov %s895_s8 }
 0x266   : > { %s1105_s21 = smov %s864_s30  ;;  %21 = sbr.rel (!%p19_p7) target bundleno = 6 (0x6), region = 89 }
 0x26d   :  { %476 = vsyncpa [#allocation3], 1 }
 0x26e   :  { %478 = vsyncpa [#allocation3 + $0x1], 1 }
 0x26f   :  { %479 = vsyncpa [#allocation6], 1 }
 0x270   :  { %480 = vsyncpa [#allocation4], 1 }
 0x271   :  { %482 = vsyncpa [#allocation4 + $0x1], 1 }

</bundles_post_ra>
